<compile_context>
chip_gen: v6e
topology: v6e:2x2x1
jax: 0.10.0
libtpu: 0.0.40
codegen_flags: <defaults>
</compile_context>

<pallas_src>
import jax
import jax.numpy as jnp
import numpy as np
from jax.experimental import pallas as pl
from jax.experimental.pallas import tpu as pltpu


def _round_up(x, m):
    return (x + m - 1) // m * m


def _largest_divisor_tile(total, target, unit):
    """Largest multiple of `unit` that divides `total` and is <= max(target, unit)."""
    target = max(target, unit)
    best = unit
    for mult in range(1, total // unit + 1):
        cand = mult * unit
        if total % cand == 0 and cand <= target:
            best = cand
    return best


# ---------------------------------------------------------------------------
# Kernels
# ---------------------------------------------------------------------------
def _nocluster_fused_kernel(bagw_ref, emb_ref, wt_ref, bias_ref, inv_ref, out_ref):
    """1-D grid over bag tiles; padded table resident in VMEM."""
    # EmbeddingBag(sum) on the MXU: (tm, v_pad) @ (v_pad, d_pad), f32 accumulation.
    men = jnp.dot(bagw_ref[...], emb_ref[...], preferred_element_type=jnp.float32)
    # mean = sum * (1 / bag_size), exact f32 per-bag scale (VPU, free under MXU/DMA).
    men = men * inv_ref[...]
    # Dropout is identity at inference.  Linear: men @ W^T (W pre-transposed at init).
    scores = jnp.dot(men.astype(wt_ref.dtype), wt_ref[...],
                     preferred_element_type=jnp.float32)
    out_ref[...] = (scores + bias_ref[...]).astype(out_ref.dtype)


def _nocluster_acc_kernel(bagw_ref, emb_ref, wt_ref, bias_ref, inv_ref, out_ref, men_acc):
    """2-D grid (bag tiles, vocab tiles); vocab is the contraction (innermost) axis."""
    k = pl.program_id(1)

    @pl.when(k == 0)
    def _init():
        men_acc[...] = jnp.zeros_like(men_acc)

    men_acc[...] += jnp.dot(bagw_ref[...], emb_ref[...],
                            preferred_element_type=jnp.float32)

    @pl.when(k == pl.num_programs(1) - 1)
    def _finalize():
        men = men_acc[...] * inv_ref[...]          # exact f32 mean scaling
        scores = jnp.dot(men.astype(wt_ref.dtype), wt_ref[...],
                         preferred_element_type=jnp.float32)
        out_ref[...] = (scores + bias_ref[...]).astype(out_ref.dtype)


# ---------------------------------------------------------------------------
# One-time parameter prep (hoisted out of the per-call forward)
# ---------------------------------------------------------------------------
def init_nocluster_params(emb_table, lin_w, log_bias, *, param_dtype=jnp.bfloat16):
    """Pad/cast the model parameters once; reuse across all forward calls."""
    word_size, emb_len = emb_table.shape
    type_size = lin_w.shape[0]
    v_pad = _round_up(word_size, 128)
    d_pad = _round_up(emb_len, 128)
    t_pad = _round_up(type_size, 128)
    emb_p = jnp.pad(emb_table.astype(param_dtype),
                    ((0, v_pad - word_size), (0, d_pad - emb_len)))
    wt_p = jnp.pad(lin_w.T.astype(param_dtype),
                   ((0, d_pad - emb_len), (0, t_pad - type_size)))
    bias_p = jnp.pad(log_bias.astype(jnp.float32).reshape(1, type_size),
                     ((0, 0), (0, t_pad - type_size)))
    return {
        "emb": emb_p, "wt": wt_p, "bias": bias_p,
        "word_size": word_size, "emb_len": emb_len, "type_size": type_size,
    }


# ---------------------------------------------------------------------------
# Per-call bag counts (no scatter: two small mask matmuls)
# ---------------------------------------------------------------------------
def _build_bag_counts(feature_seq, offset_seq, num_bags_pad, word_size, word_size_pad):
    """counts[b, w] = #occurrences of word w in bag b (exact integers);
       inv_size[b] = 1 / max(bag_size, 1)."""
    seq_len = feature_seq.shape[0]
    feature_seq = feature_seq.astype(jnp.int32)
    offset_seq = offset_seq.astype(jnp.int32)
    pos = jnp.arange(seq_len, dtype=jnp.int32)
    # bag id of each position = (#offsets <= pos) - 1  (offsets sorted, offsets[0] == 0)
    bag_id = jnp.sum(pos[:, None] >= offset_seq[None, :], axis=1).astype(jnp.int32) - 1
    valid = (bag_id >= 0) & (feature_seq >= 0) & (feature_seq < word_size)
    bag_mask = ((bag_id[None, :] == jnp.arange(num_bags_pad, dtype=jnp.int32)[:, None])
                & valid[None, :]).astype(jnp.float32)                 # (bags_pad, seq)
    word_onehot = (feature_seq[:, None] ==
                   jnp.arange(word_size_pad, dtype=jnp.int32)[None, :]
                   ).astype(jnp.float32)                              # (seq, vocab_pad)
    counts = bag_mask @ word_onehot                                   # (bags_pad, vocab_pad)
    bag_sizes = bag_mask.sum(axis=1)
    inv_size = 1.0 / jnp.maximum(bag_sizes, 1.0)
    return counts, inv_size


# ---------------------------------------------------------------------------
# Forward
# ---------------------------------------------------------------------------
def nocluster_forward(params, feature_seq, offset_seq, *,
                      bag_tile=None, vocab_tile=2048,
                      max_fused_vmem_bytes=10 * 2**20):
    """feature_seq: (seq_len,) int32 word ids; offset_seq: (num_bags,) int32 bag starts."""
    emb_p, wt_p, bias_p = params["emb"], params["wt"], params["bias"]
    v_pad, d_pad = emb_p.shape
    t_pad = wt_p.shape[1]
    word_size = params["word_size"]
    type_size = params["type_size"]
    pdt = emb_p.dtype
    itemsize = jnp.dtype(pdt).itemsize
    num_bags = offset_seq.shape[0]

    # Bag tile: multiple of 16 (bf16 sublane packing), capped at 256 (MXU width on
    # v6e/v7x), and >= 2 tiles whenever possible so both v7x TensorCores are fed
    # along the "parallel" bag axis.
    b0 = _round_up(max(num_bags, 1), 16)
    if bag_tile is None:
        tm = min(256, b0)
        if b0 > 16 and b0 // tm < 2:
            tm = max(16, _round_up((b0 + 1) // 2, 16))
    else:
        tm = min(_round_up(bag_tile, 16), b0)
    b_pad = _round_up(b0, tm)

    # Per-call inputs: exact integer counts (bf16-exact) + f32 inverse bag sizes.
    counts, inv_size = _build_bag_counts(feature_seq, offset_seq, b_pad, word_size, v_pad)
    bag_w = counts.astype(pdt)
    inv_col = inv_size.reshape(b_pad, 1).astype(jnp.float32)

    # Double-buffered VMEM footprint of the fused (table-resident) layout.
    const_bytes = 2 * (v_pad * d_pad * itemsize + d_pad * t_pad * itemsize + t_pad * 4)
    per_tile_bytes = 2 * (tm * v_pad * itemsize + tm * 4 + tm * t_pad * 4)
    fused_bytes = const_bytes + per_tile_bytes

    if fused_bytes <= max_fused_vmem_bytes:
        # ---- 1-D grid: whole padded table resident in VMEM, fused matmul->scale->matmul.
        out = pl.pallas_call(
            _nocluster_fused_kernel,
            out_shape=jax.ShapeDtypeStruct((b_pad, t_pad), jnp.float32),
            grid_spec=pltpu.PrefetchScalarGridSpec(
                num_scalar_prefetch=0,
                grid=(b_pad // tm,),
                in_specs=[
                    pl.BlockSpec((tm, v_pad), lambda i: (i, 0)),     # bag word counts
                    pl.BlockSpec((v_pad, d_pad), lambda i: (0, 0)),  # embedding table
                    pl.BlockSpec((d_pad, t_pad), lambda i: (0, 0)),  # W^T
                    pl.BlockSpec((1, t_pad), lambda i: (0, 0)),      # log(label_distribution)
                    pl.BlockSpec((tm, 1), lambda i: (i, 0)),         # 1 / bag_size
                ],
                out_specs=pl.BlockSpec((tm, t_pad), lambda i: (i, 0)),
            ),
            compiler_params=pltpu.CompilerParams(
                dimension_semantics=("parallel",)),
        )(bag_w, emb_p, wt_p, bias_p, inv_col)
    else:
        # ---- 2-D grid fallback for large tables: vocab contraction with f32 accumulator.
        tk = _largest_divisor_tile(v_pad, min(vocab_tile, v_pad), 128)
        acc_bytes = tm * d_pad * 4
        two_d_bytes = (2 * (tm * tk + tk * d_pad + d_pad * t_pad) * itemsize
                       + 2 * (t_pad * 4 + tm * 4 + tm * t_pad * 4) + acc_bytes)
        cparams = {"dimension_semantics": ("parallel", "arbitrary")}
        if two_d_bytes > 12 * 2**20:
            # Explicit scoped-VMEM budget (v5e default is only 16 MiB); stay under
            # v7x's 64 MiB physical VMEM per TensorCore.
            cparams["vmem_limit_bytes"] = min(int(two_d_bytes * 1.5), 64 * 2**20)
        out = pl.pallas_call(
            _nocluster_acc_kernel,
            out_shape=jax.ShapeDtypeStruct((b_pad, t_pad), jnp.float32),
            grid_spec=pltpu.PrefetchScalarGridSpec(
                num_scalar_prefetch=0,
                grid=(b_pad // tm, v_pad // tk),
                in_specs=[
                    pl.BlockSpec((tm, tk), lambda i, k: (i, k)),        # bag word counts
                    pl.BlockSpec((tk, d_pad), lambda i, k: (k, 0)),     # embedding tile
                    pl.BlockSpec((d_pad, t_pad), lambda i, k: (0, 0)),  # W^T
                    pl.BlockSpec((1, t_pad), lambda i, k: (0, 0)),      # bias
                    pl.BlockSpec((tm, 1), lambda i, k: (i, 0)),         # 1 / bag_size
                ],
                out_specs=pl.BlockSpec((tm, t_pad), lambda i, k: (i, 0)),
                scratch_shapes=[pltpu.VMEM((tm, d_pad), jnp.float32)],
            ),
            compiler_params=pltpu.CompilerParams(**cparams),
        )(bag_w, emb_p, wt_p, bias_p, inv_col)

    return out[:num_bags, :type_size]


# ---------------------------------------------------------------------------
# Pure-JAX reference (EmbeddingBag mean + Linear + fixed bias)
# ---------------------------------------------------------------------------
def reference_forward(feature_seq, offset_seq, emb_table, lin_w, log_bias):
    seq_len = feature_seq.shape[0]
    num_bags = offset_seq.shape[0]
    gathered = emb_table[feature_seq]                                      # (seq, emb)
    pos = jnp.arange(seq_len)
    bag_id = jnp.sum(pos[:, None] >= offset_seq[None, :], axis=1) - 1
    mask = (bag_id[None, :] == jnp.arange(num_bags)[:, None]).astype(jnp.float32)
    sizes = jnp.maximum(mask.sum(axis=1, keepdims=True), 1.0)
    men = (mask @ gathered) / sizes                                        # (bags, emb)
    return men @ lin_w.T + log_bias[None, :]


if __name__ == "__main__":
    # Small synthetic opt: word_size=300, emb_len=32, type_size=10, seq=96, bags=24.
    word_size, emb_len, type_size = 300, 32, 10
    seq_len, num_bags = 96, 24

    key = jax.random.PRNGKey(0)
    k_feat, k_off, k_emb, k_w, k_dist = jax.random.split(key, 5)

    feature_seq = jax.random.randint(k_feat, (seq_len,), 0, word_size, dtype=jnp.int32)
    # Sorted bag start offsets with offset[0] == 0 and uneven bag sizes.
    cuts = jnp.sort(jax.random.choice(k_off, seq_len - 1, (num_bags - 1,), replace=False) + 1)
    offset_seq = jnp.concatenate([jnp.zeros((1,), jnp.int32), cuts.astype(jnp.int32)])

    # Deterministic synthetic parameters (shapes follow the module __init__).
    emb_table = jax.random.normal(k_emb, (word_size, emb_len), dtype=jnp.float32)
    lin_w = 0.1 * jax.random.normal(k_w, (type_size, emb_len), dtype=jnp.float32)
    label_distribution = jax.nn.softmax(jax.random.normal(k_dist, (type_size,)))
    log_bias = jnp.log(label_distribution.astype(jnp.float32))   # opt['bias'] == 'fix'

    ref = reference_forward(feature_seq, offset_seq, emb_table, lin_w, log_bias)

    # One-time parameter prep (hoisted out of the per-call forward).
    params_f32 = init_nocluster_params(emb_table, lin_w, log_bias, param_dtype=jnp.float32)
    params_bf16 = init_nocluster_params(emb_table, lin_w, log_bias, param_dtype=jnp.bfloat16)

    # f32-param path, fused 1-D grid (table resident in VMEM; 2 bag tiles -> both v7x TCs).
    out_f32 = nocluster_forward(params_f32, feature_seq, offset_seq)
    out_f32 = jax.block_until_ready(out_f32)
    np.testing.assert_allclose(np.asarray(out_f32), np.asarray(ref), rtol=5e-3, atol=5e-3)

    # bf16-param path (default; exact integer counts + f32 mean scaling in-kernel).
    out_bf16 = nocluster_forward(params_bf16, feature_seq, offset_seq)
    out_bf16 = jax.block_until_ready(out_bf16)
    np.testing.assert_allclose(np.asarray(out_bf16), np.asarray(ref), rtol=2e-2, atol=2e-2)

    # Force the 2-D accumulator fallback (large-table path) to exercise it end-to-end.
    out_2d = nocluster_forward(params_bf16, feature_seq, offset_seq,
                               vocab_tile=128, max_fused_vmem_bytes=0)
    out_2d = jax.block_until_ready(out_2d)
    np.testing.assert_allclose(np.asarray(out_2d), np.asarray(ref), rtol=2e-2, atol=2e-2)

    print("KERNEL_OK")
</pallas_src>

<mosaic_0001>
module attributes {stable_mosaic.version = 11 : i64} {
  func.func @_nocluster_fused_kernel(%arg0: i32, %arg1: memref<16x384xf32, #tpu.memory_space<vmem>>, %arg2: memref<384x128xf32, #tpu.memory_space<vmem>>, %arg3: memref<128x128xf32, #tpu.memory_space<vmem>>, %arg4: memref<1x128xf32, #tpu.memory_space<vmem>>, %arg5: memref<16x1xf32, #tpu.memory_space<vmem>>, %arg6: memref<16x128xf32, #tpu.memory_space<vmem>>) attributes {dimension_semantics = [#tpu.dimension_semantics<parallel>], iteration_bounds = array<i64: 2>, scalar_prefetch = 0 : i64, scratch_operands = 0 : i64, tpu.core_type = #tpu.core_type<tc>, window_params = [{transform_indices = @transform_0, window_bounds = array<i64: 16, 384>}, {pipeline_mode = #tpu.pipeline_mode<synchronous>, transform_indices = @transform_1, window_bounds = array<i64: 384, 128>}, {pipeline_mode = #tpu.pipeline_mode<synchronous>, transform_indices = @transform_2, window_bounds = array<i64: 128, 128>}, {pipeline_mode = #tpu.pipeline_mode<synchronous>, transform_indices = @transform_3, window_bounds = array<i64: 1, 128>}, {transform_indices = @transform_4, window_bounds = array<i64: 16, 1>}, {transform_indices = @transform_5, window_bounds = array<i64: 16, 128>}]} {
    %c0 = arith.constant 0 : index
    %c0_0 = arith.constant 0 : index
    %0 = vector.load %arg1[%c0, %c0_0] : memref<16x384xf32, #tpu.memory_space<vmem>>, vector<16x384xf32>
    %c0_1 = arith.constant 0 : index
    %c0_2 = arith.constant 0 : index
    %1 = vector.load %arg2[%c0_1, %c0_2] : memref<384x128xf32, #tpu.memory_space<vmem>>, vector<384x128xf32>
    %cst = arith.constant dense<0.000000e+00> : vector<16x128xf32>
    %2 = tpu.matmul %0, %1, %cst {dimension_numbers = #tpu.dot_dimension_numbers<[1], [0], [0], [1], [0, 0, 1, 1], [], []>} : vector<16x384xf32>, vector<384x128xf32>, vector<16x128xf32> -> vector<16x128xf32>
    %c0_3 = arith.constant 0 : index
    %c0_4 = arith.constant 0 : index
    %3 = vector.load %arg5[%c0_3, %c0_4] : memref<16x1xf32, #tpu.memory_space<vmem>>, vector<16x1xf32>
    %4 = vector.broadcast %3 : vector<16x1xf32> to vector<16x128xf32>
    %5 = arith.mulf %2, %4 : vector<16x128xf32>
    %c0_5 = arith.constant 0 : index
    %c0_6 = arith.constant 0 : index
    %6 = vector.load %arg3[%c0_5, %c0_6] : memref<128x128xf32, #tpu.memory_space<vmem>>, vector<128x128xf32>
    %cst_7 = arith.constant dense<0.000000e+00> : vector<16x128xf32>
    %7 = tpu.matmul %5, %6, %cst_7 {dimension_numbers = #tpu.dot_dimension_numbers<[1], [0], [0], [1], [0, 0, 1, 1], [], []>} : vector<16x128xf32>, vector<128x128xf32>, vector<16x128xf32> -> vector<16x128xf32>
    %c0_8 = arith.constant 0 : index
    %c0_9 = arith.constant 0 : index
    %8 = vector.load %arg4[%c0_8, %c0_9] : memref<1x128xf32, #tpu.memory_space<vmem>>, vector<1x128xf32>
    %9 = vector.broadcast %8 : vector<1x128xf32> to vector<16x128xf32>
    %10 = arith.addf %7, %9 : vector<16x128xf32>
    %c0_10 = arith.constant 0 : index
    %c0_11 = arith.constant 0 : index
    %11 = vector.load %arg6[%c0_10, %c0_11] : memref<16x128xf32, #tpu.memory_space<vmem>>, vector<16x128xf32>
    tpu.vector_store %arg6[%c0_10, %c0_11], %10 {strides = array<i32>} : memref<16x128xf32, #tpu.memory_space<vmem>>, vector<16x128xf32>,
    return
  }
  func.func @transform_0(%arg0: i32) -> (i32, i32) {
    %c0_i32 = arith.constant 0 : i32
    %c0_i32_0 = arith.constant 0 : i32
    return %arg0, %c0_i32 : i32, i32
  }
  func.func @transform_1(%arg0: i32) -> (i32, i32) {
    %c0_i32 = arith.constant 0 : i32
    %c0_i32_0 = arith.constant 0 : i32
    %c0_i32_1 = arith.constant 0 : i32
    return %c0_i32, %c0_i32_0 : i32, i32
  }
  func.func @transform_2(%arg0: i32) -> (i32, i32) {
    %c0_i32 = arith.constant 0 : i32
    %c0_i32_0 = arith.constant 0 : i32
    %c0_i32_1 = arith.constant 0 : i32
    return %c0_i32, %c0_i32_0 : i32, i32
  }
  func.func @transform_3(%arg0: i32) -> (i32, i32) {
    %c0_i32 = arith.constant 0 : i32
    %c0_i32_0 = arith.constant 0 : i32
    %c0_i32_1 = arith.constant 0 : i32
    return %c0_i32, %c0_i32_0 : i32, i32
  }
  func.func @transform_4(%arg0: i32) -> (i32, i32) {
    %c0_i32 = arith.constant 0 : i32
    %c0_i32_0 = arith.constant 0 : i32
    return %arg0, %c0_i32 : i32, i32
  }
  func.func @transform_5(%arg0: i32) -> (i32, i32) {
    %c0_i32 = arith.constant 0 : i32
    %c0_i32_0 = arith.constant 0 : i32
    return %arg0, %c0_i32 : i32, i32
  }
}

</mosaic_0001>

<bundles_post_ra>
// kernel: tpu_custom_call.1
= control target key start
LH: loop header
LB: loop body
LE: loop exit
PB: predicated region body
PF: predicated region fallthrough
CT: control target
= control target key end

     0   :  { %10 = vsyncpa [#allocation3], 0  ;;  %s1377_s0 = inlined_call_operand.hbm [shape: f32[32,384], index: 0, kind: input, shape index: {}]   ;;  %s1378_s1 = inlined_call_operand.hbm [shape: f32[384,128], index: 1, kind: input, shape index: {}]   ;;  %s1379_s2 = inlined_call_operand.hbm [shape: f32[128,128], index: 2, kind: input, shape index: {}]   ;;  %s1380_s3 = inlined_call_operand.vmem [shape: f32[1,128], index: 3, kind: input, shape index: {}]   ;;  %s1381_s4 = inlined_call_operand.vmem [shape: f32[32,1], index: 4, kind: input, shape index: {}]   ;;  %s1382_s5 = inlined_call_operand.hbm [shape: f32[32,128], index: 5, kind: output, shape index: {}]  }
   0x1   :  { %12 = vsyncpa [#allocation3 + $0x1], 0 }
   0x2   :  { %13 = vsyncpa [#allocation6], 0 }
   0x3   :  { %14 = vsyncpa [#allocation4], 0 }
   0x4   :  { %16 = vsyncpa [#allocation4 + $0x1], 0  ;;  %s1167_s18 = smov 0   ;;  %s1169_s19 = smov 0  }
   0x5   :  { %s1171_s20 = smov 0   ;;  %s1173_s21 = smov 0  }
   0x6 LB: > { %s1188_s22 = sadd.s32 4294967295, %s1124_s21   ;;  %s733_s23 = sadd.s32 4294967294, %s1124_s21   ;;  %s1124_s21 = sphi %s1173_s21, %s1405_s21   ;;  %s1120_s20 = sphi %s1171_s20, %s1404_s20   ;;  %s1116_s19 = sphi %s1169_s19, %s1403_s19   ;;  %s1112_s18 = sphi %s1167_s18, %s1402_s18  }
   0x7   : > { %p42_p0 = scmp.ne.s32.totalorder %s1116_s19, %s1112_s18  ;;  %p1383_p1 = scmp.eq.s32.totalorder %s1188_s22, 0 }
   0x8   : > { %p161_p3 = scmp.eq.s32.totalorder %s733_s23, 1  ;;  %p734_p5 = scmp.ge.s32.totalorder %s1124_s21, 1 }
   0x9   : > { %p1197_p4 = por %p1383_p1, %p42_p0  ;;  %p168_p7 = scmp.lt.s32.totalorder %s1124_s21, 3 }
   0xa   : > { %p1202_p6 = por %p161_p3, %p42_p0  ;;  %s1126_s27 = smov [#allocation5]  }
   0xb   : > { %s1387_s24 = scalar_select %p1197_p4, 1, 0 }
   0xc   : > { %s1388_s25 = scalar_select %p1202_p6, 1, 0 }
   0xd   : > { %p1207_p8 = pnand %p734_p5, %p168_p7  ;;  %s180_s28 = sshll.u32 %s1126_s27, 4  ;;  %s181_s28 = int_to_ptr.vmem [resolvable:$true] %s180_s28 }
   0xe   : > { %s1127_s30 = smov [#allocation7]   ;;  %s987_s7 = scalar_lea.vmem %s181_s28, 6144 }
   0xf   : > { %s1389_s26 = scalar_select %p1207_p8, 1, 0 }
  0x10   : > { %p913_p9 = pneg %p1207_p8  ;;  %s193_s6 = sshll.u32 %s1127_s30, 4  ;;  %s194_s6 = int_to_ptr.vmem [resolvable:$true] %s193_s6 }
  0x11   : > { %p988_p13 = scmp.ne.s32.totalorder %s181_s28, %s987_s7  ;;  %p995_p5 = scmp.lt.s32.totalorder %s181_s28, %s181_s28 }
  0x12   : > { %p1216_p11 = pnand %p913_p9, %p1383_p1  ;;  %p996_p7 = scmp.lt.s32.totalorder %s987_s7, %s987_s7 }
  0x14   : > { %p978_p12 = pneg %p1216_p11  ;;  %p997_p10 = por %p996_p7, %p995_p5 }
  0x16   : > { %p990_p0 = pnand %p988_p13, %p978_p12 }
  0x18   : > { %p991_p3 = pneg %p990_p0 }
  0x1a   : > { %p998_p9 = pnand %p997_p10, %p991_p3 }
  0x1c   : > { %1001 = shalt.err (!%p998_p9)
}
  0x1d   : > { %s1128_s8 = smov 128   ;;  %s1129_s9 = smov 8  }
  0x1e   : > { %916 = dma.hbm_to_vmem [thread:$0]  (!%p1216_p11), %s1378_s1, 6144, %s181_s28, [#allocation6], %s1128_s8, %s1128_s8, %s1129_s9  }
  0x1f   : > { %s1013_s12 = scalar_lea.vmem %s194_s6, 2048  ;;  %p1021_p2 = scmp.lt.s32.totalorder %s194_s6, %s194_s6 }
  0x20   : > { %p1014_p1 = scmp.ne.s32.totalorder %s194_s6, %s1013_s12  ;;  %p1022_p6 = scmp.lt.s32.totalorder %s1013_s12, %s1013_s12 }
  0x22   : > { %p1016_p13 = pnand %p1014_p1, %p978_p12  ;;  %p1023_p5 = por %p1022_p6, %p1021_p2 }
  0x24   : > { %p1017_p0 = pneg %p1016_p13 }
  0x26   : > { %p1024_p10 = pnand %p1023_p5, %p1017_p0 }
  0x28   : > { %1027 = shalt.err (!%p1024_p10)
}
  0x29   : > { %919 = dma.hbm_to_vmem [thread:$0]  (!%p1216_p11), %s1379_s2, 2048, %s194_s6, [#allocation6], %s1128_s8, %s1128_s8, %s1129_s9  }
  0x2a   : > { %s1239_s15 = sadd.s32 1, %s1124_s21   ;;  %s29_s16 = sadd.s32 1, %s1120_s20 }
  0x2b   : > { %s26_s17 = ssub.s32 %s1124_s21, %s1239_s15  ;;  %p36_p1 = scmp.ne.s32.totalorder %s1120_s20, %s1116_s19 }
  0x2c   : > { %p27_p2 = scmp.eq.s32.totalorder %s26_s17, 0  ;;  %p37_p6 = scmp.eq.s32.totalorder %s1124_s21, 0 }
  0x2d   : > { %p1391_p12 = scmp.eq.s32.totalorder %s1188_s22, 1  ;;  %p930_p7 = scmp.lt.s32.totalorder %s1124_s21, 2 }
  0x2e   : > { %s1255_s27 = scalar_select %p27_p2, %s1120_s20, %s29_s16  }
  0x2f   : > { %p1249_p3 = por %p1391_p12, %p36_p1  ;;  %p38_p9 = por %p37_p6, %p36_p1 }
  0x30   : > { %s210_s28 = sand.u32 1, %s1120_s20   ;;  %s899_s30 = smul.u32 768, %s1124_s21 }
  0x31   : > { %s1392_s23 = scalar_select %p1249_p3, 1, 0 }
  0x32   : > { %s898_s29 = smul.u32 48, %s210_s28  ;;  %p1259_p11 = pnand %p930_p7, %p38_p9 }
  0x33   : > { %s1266_s9 = scalar_lea.hbm %s1377_s0, %s899_s30  ;;  %s1270_s12 = scalar_lea.sflag [#allocation3], %s210_s28 }
  0x34   : > { %s214_s10 = scalar_lea.vmem [#allocation2], %s898_s29  ;;  %s1028_s13 = scalar_lea.hbm %s1266_s9, 768 }
  0x35   : > { %s222_s11 = sshll.u32 %s214_s10, 4  ;;  %p1029_p13 = scmp.ne.s32.totalorder %s1266_s9, %s1028_s13  ;;  %s1268_s11 = int_to_ptr.vmem [resolvable:$true] %s222_s11 }
  0x36   : > { %p1030_p0 = pneg %p1259_p11  ;;  %s1033_s17 = scalar_lea.hbm %s1377_s0, 1536 }
  0x37   : > { %p1034_p1 = scmp.lt.s32.totalorder %s1266_s9, %s1377_s0  ;;  %p1035_p2 = scmp.lt.s32.totalorder %s1033_s17, %s1028_s13 }
  0x38   : > { %p1031_p5 = pnand %p1030_p0, %p1029_p13 }
  0x39   : > { %p1036_p6 = por %p1035_p2, %p1034_p1 }
  0x3a   : > { %p1032_p10 = pneg %p1031_p5 }
  0x3c   : > { %p1037_p12 = pnand %p1036_p6, %p1032_p10 }
  0x3e   : > { %1040 = shalt.err (!%p1037_p12)
}
  0x3f   : > { %s1041_s28 = scalar_lea.vmem %s1268_s11, 768  ;;  %s1130_s29 = smov [#allocation2]  }
  0x40   : > { %p1042_p7 = scmp.ne.s32.totalorder %s1268_s11, %s1041_s28  ;;  %s1046_s8 = sshll.u32 %s1130_s29, 4  ;;  %s1047_s8 = int_to_ptr.vmem [resolvable:$false] %s1046_s8 }
  0x41   : > { %s1048_s10 = scalar_lea.vmem %s1047_s8, 1536  ;;  %p1049_p5 = scmp.lt.s32.totalorder %s1268_s11, %s1047_s8 }
  0x42   : > { %p1044_p9 = pnand %p1042_p7, %p1030_p0  ;;  %p1050_p3 = scmp.lt.s32.totalorder %s1048_s10, %s1041_s28 }
  0x44   : > { %p1045_p13 = pneg %p1044_p9  ;;  %p1051_p4 = por %p1050_p3, %p1049_p5 }
  0x46   : > { %p1052_p8 = pnand %p1051_p4, %p1045_p13 }
  0x48   : > { %1055 = shalt.err (!%p1052_p8)
}
  0x49   : > { %s1131_s13 = smov 384   ;;  %s1132_s14 = smov 24  }
  0x4a   : > { %923 = dma.hbm_to_vmem [thread:$0]  (!%p1259_p11), %s1266_s9, 768, %s1268_s11, %s1270_s12, %s1131_s13, %s1131_s13, %s1132_s14  }
  0x4b   : > { %p1394_p0 = scmp.ne.s32.totalorder %s1389_s26, 0 }
  0x4c   : > { %s1294_s16 = sand.u32 (!%p1394_p0), 1, %s1116_s19   ;;  %p1395_p4 = scmp.ne.s32.totalorder (!%p1394_p0), %s1387_s24, 0 }
  0x4d   : > { %243 = sbr.rel (%p1394_p0) target bundleno = 535 (0x217), region = 40  ;;  %s246_s30 = scalar_lea.sflag (!%p1394_p0), [#allocation3], %s1294_s16 }
  0x4e   : > { %s900_s17 = smul.u32 (!%p1394_p0), 48, %s1294_s16 }
  0x50   : > { %s1298_s7 = scalar_lea.vmem (!%p1394_p0), [#allocation2], %s900_s17 }
  0x52   : > { %1099 = dma.done.wait (%p1395_p4), %s246_s30, 768  }
  0x53   : > { %1101 = vsyncadd (%p1395_p4), %s246_s30, 4294966528  ;;  %p1396_p8 = scmp.eq.s32.totalorder %s1188_s22, 0 }
  0x55   : > { %1103 = dma.done.wait (%p1396_p8), [#allocation6], 8192   ;;  %p1397_p3 = pmov %p1396_p8 }
  0x56   : > { %v1133_v0 = vmov 0   ;;  %v334_v1 = vld [vmem:[#allocation5 + $0xf8] sm:$0xff]  ;;  %v333_v3 = vld [vmem:[#allocation5 + $0xf0] sm:$0xff]  ;;  %v332_v6 = vld [vmem:[#allocation5 + $0xe8] sm:$0xff]  ;;  %s745_s24 = sshll.u32 %s1188_s22, 1  ;;  %s744_s28 = sshll.u32 %s1294_s16, 4 }
  0x57   : > { %1105 = vsyncadd (%p1397_p3), [#allocation6], 4294959104  ;;  %975 = vset.pattern.permute.xlu0 %v1133_v0  ;;  %v318_v2 = vld [vmem:[#allocation5 + $0x78] sm:$0xff]  ;;  %754 = vmatprep.subr.mxu0 %v334_v1  ;;  %v317_v5 = vld [vmem:[#allocation5 + $0x70] sm:$0xff]  ;;  %p1309_p11 = scmp.lt.s32.totalorder %s745_s24, 3  ;;  %s288_s10 = scalar_lea.vmem [#allocation8], %s744_s28 }
  0x58   : > { %v350_v4 = vld [vmem:[#allocation5 + $0x178] sm:$0xff]  ;;  %755 = vmatpush3.msra.mxu0 %v318_v2  ;;  %v349_v7 = vld [vmem:[#allocation5 + $0x170] sm:$0xff]  ;;  %v316_v8 = vld [vmem:[#allocation5 + $0x68] sm:$0xff]  ;;  %s629_s13 = sshll.u32 %s288_s10, 4  ;;  %s753_s14 = sshll.u32 %s1188_s22, 8  ;;  %s1329_s13 = int_to_ptr.vmem [resolvable:$true] %s629_s13 }
  0x59   : > { %828 = vmatprep.subr.mxu1 %v350_v4  ;;  %756 = vmatprep.subr.mxu0 %v333_v3  ;;  %v348_v9 = vld [vmem:[#allocation5 + $0x168] sm:$0xff]  ;;  %v331_v10 = vld [vmem:[#allocation5 + $0xe0] sm:$0xff]  ;;  %v330_v13 = vld [vmem:[#allocation5 + $0xd8] sm:$0xff]  ;;  %s1407_s24 = smov (!%p1309_p11, %s745_s24), 3  ;;  %s1056_s26 = scalar_lea.vmem %s1329_s13, 256 }
  0x5a   : > { %829 = vmatpush3.msra.mxu1 %v350_v4  ;;  %757 = vmatpush3.msra.mxu0 %v317_v5  ;;  %v315_v11 = vld [vmem:[#allocation5 + $0x60] sm:$0xff]  ;;  %v314_v14 = vld [vmem:[#allocation5 + $0x58] sm:$0xff]  ;;  %v329_v16 = vld [vmem:[#allocation5 + $0xd0] sm:$0xff]  ;;  %s746_s6 = sshll.u32 %s1407_s24, 3  ;;  %s616_s24 = scalar_lea.sflag [#allocation4], %s1294_s16 }
  0x5b   : > { %830 = vmatprep.subr.mxu1 %v349_v7  ;;  %758 = vmatprep.subr.mxu0 %v332_v6  ;;  %v347_v12 = vld [vmem:[#allocation5 + $0x160] sm:$0xff]  ;;  %v346_v15 = vld [vmem:[#allocation5 + $0x158] sm:$0xff]  ;;  %v313_v17 = vld [vmem:[#allocation5 + $0x50] sm:$0xff]  ;;  %s294_s12 = scalar_lea.vmem %s1381_s4, %s746_s6  ;;  %p1057_p10 = scmp.ne.s32.totalorder %s1329_s13, %s1056_s26 }
  0x5c   : > { %831 = vmatpush3.msra.mxu1 %v349_v7  ;;  %759 = vmatpush3.msra.mxu0 %v316_v8  ;;  %v345_v18 = vld [vmem:[#allocation5 + $0x150] sm:$0xff]  ;;  %v328_v19 = vld [vmem:[#allocation5 + $0xc8] sm:$0xff]  ;;  %v327_v22 = vld [vmem:[#allocation5 + $0xc0] sm:$0xff]  ;;  %p1399_p1 = scmp.ne.s32.totalorder %s1392_s23, 0  ;;  %s1134_s22 = smov [#allocation8]  }
  0x5d   : > { %832 = vmatprep.subr.mxu1 %v348_v9  ;;  %760 = vmatprep.subr.mxu0 %v331_v10  ;;  %v312_v20 = vld [vmem:[#allocation5 + $0x48] sm:$0xff]  ;;  %v311_v23 = vld [vmem:[#allocation5 + $0x40] sm:$0xff]  ;;  %v326_v25 = vld [vmem:[#allocation5 + $0xb8] sm:$0xff]  ;;  %s1060_s6 = sshll.u32 %s1134_s22, 4  ;;  %s1061_s6 = int_to_ptr.vmem [resolvable:$false] %s1060_s6 }
  0x5e   : > { %833 = vmatpush3.msra.mxu1 %v348_v9  ;;  %761 = vmatpush3.msra.mxu0 %v315_v11  ;;  %v344_v21 = vld [vmem:[#allocation5 + $0x148] sm:$0xff]  ;;  %v343_v24 = vld [vmem:[#allocation5 + $0x140] sm:$0xff]  ;;  %v310_v26 = vld [vmem:[#allocation5 + $0x38] sm:$0xff]  ;;  %p1058_p2 = pnand %p1057_p10, %p1399_p1  ;;  %s1062_s9 = scalar_lea.vmem %s1061_s6, 512 }
  0x5f   : > { %834 = vmatprep.subr.mxu1 %v347_v12  ;;  %762 = vmatprep.subr.mxu0 %v330_v13  ;;  %v342_v27 = vld [vmem:[#allocation5 + $0x138] sm:$0xff]  ;;  %v325_v28 = vld [vmem:[#allocation5 + $0xb0] sm:$0xff]  ;;  %v324_v31 = vld [vmem:[#allocation5 + $0xa8] sm:$0xff]  ;;  %p1063_p12 = scmp.lt.s32.totalorder %s1329_s13, %s1061_s6  ;;  %p1064_p7 = scmp.lt.s32.totalorder %s1062_s9, %s1056_s26 }
  0x60   : > { %835 = vmatpush3.msra.mxu1 %v347_v12  ;;  %763 = vmatpush3.msra.mxu0 %v314_v14  ;;  %v309_v29 = vld [vmem:[#allocation5 + $0x30] sm:$0xff]  ;;  %v308_v32 = vld [vmem:[#allocation5 + $0x28] sm:$0xff]  ;;  %v323_v34 = vld [vmem:[#allocation5 + $0xa0] sm:$0xff]  ;;  %p1059_p6 = pneg %p1058_p2 }
  0x61   : > { %836 = vmatprep.subr.mxu1 %v346_v15  ;;  %764 = vmatprep.subr.mxu0 %v329_v16  ;;  %v341_v30 = vld [vmem:[#allocation5 + $0x130] sm:$0xff]  ;;  %v340_v33 = vld [vmem:[#allocation5 + $0x128] sm:$0xff]  ;;  %v307_v35 = vld [vmem:[#allocation5 + $0x20] sm:$0xff]  ;;  %p1065_p9 = por %p1064_p7, %p1063_p12 }
  0x62   : > { %837 = vmatpush3.msra.mxu1 %v346_v15  ;;  %765 = vmatpush3.msra.mxu0 %v313_v17  ;;  %v339_v36 = vld [vmem:[#allocation5 + $0x120] sm:$0xff]  ;;  %v322_v37 = vld [vmem:[#allocation5 + $0x98] sm:$0xff]  ;;  %v321_v40 = vld [vmem:[#allocation5 + $0x90] sm:$0xff] }
  0x63   : > { %838 = vmatprep.subr.mxu1 %v345_v18  ;;  %766 = vmatprep.subr.mxu0 %v328_v19  ;;  %v306_v38 = vld [vmem:[#allocation5 + $0x18] sm:$0xff]  ;;  %v305_v41 = vld [vmem:[#allocation5 + $0x10] sm:$0xff]  ;;  %v320_v43 = vld [vmem:[#allocation5 + $0x88] sm:$0xff]  ;;  %p1066_p13 = pnand %p1065_p9, %p1059_p6 }
  0x64   : > { %839 = vmatpush3.msra.mxu1 %v345_v18  ;;  %767 = vmatpush3.msra.mxu0 %v312_v20  ;;  %v338_v39 = vld [vmem:[#allocation5 + $0x118] sm:$0xff]  ;;  %v337_v42 = vld [vmem:[#allocation5 + $0x110] sm:$0xff]  ;;  %v304_v44 = vld [vmem:[#allocation5 + $0x8] sm:$0xff] }
  0x65   : > { %840 = vmatprep.subr.mxu1 %v344_v21  ;;  %768 = vmatprep.subr.mxu0 %v327_v22  ;;  %v336_v45 = vld [vmem:[#allocation5 + $0x108] sm:$0xff]  ;;  %v319_v46 = vld [vmem:[#allocation5 + $0x80] sm:$0xff]  ;;  %v530_v55 = vld [vmem:[#allocation7 + $0x78] sm:$0xff] }
  0x66   : > { %841 = vmatpush3.msra.mxu1 %v344_v21  ;;  %769 = vmatpush3.msra.mxu0 %v311_v23  ;;  %v298_v47 = vld [vmem:[%s1298_s7 + $0x8] sm:$0xff]  ;;  %v303_v48 = vld [vmem:[#allocation5] sm:$0xff]  ;;  %v300_v56 = vld [vmem:[%s1298_s7 + $0x18] sm:$0xff] }
  0x67   : > { %842 = vmatprep.subr.mxu1 %v343_v24  ;;  %770 = vmatprep.subr.mxu0 %v326_v25  ;;  %v297_v49 = vld [vmem:[%s1298_s7] sm:$0xff]  ;;  %v299_v51 = vld [vmem:[%s1298_s7 + $0x10] sm:$0xff]  ;;  %v302_v52 = vld [vmem:[%s1298_s7 + $0x28] sm:$0xff] }
  0x68   : > { %843 = vmatpush3.msra.mxu1 %v343_v24  ;;  %771 = vmatpush3.msra.mxu0 %v310_v26  ;;  %v335_v50 = vld [vmem:[#allocation5 + $0x100] sm:$0xff]  ;;  %v529_v57 = vld [vmem:[#allocation7 + $0x70] sm:$0xff]  ;;  %v502_v58 = vld [vmem:[%s294_s12 + $0x8] sm:$0xff] }
  0x69   : > { %844 = vmatprep.subr.mxu1 %v342_v27  ;;  %772 = vmatprep.subr.mxu0 %v325_v28  ;;  %v301_v53 = vld [vmem:[%s1298_s7 + $0x20] sm:$0xff]  ;;  %v528_v59 = vld [vmem:[#allocation7 + $0x68] sm:$0xff]  ;;  %v526_v61 = vld [vmem:[#allocation7 + $0x58] sm:$0xff]  ;;  %s1334_s7 = scalar_lea.hbm %s1382_s5, %s753_s14 }
  0x6a   : > { %845 = vmatpush3.msra.mxu1 %v342_v27  ;;  %773 = vmatpush3.msra.mxu0 %v309_v29  ;;  %v501_v54 = vld [vmem:[%s294_s12] sm:$0xff]  ;;  %v525_v62 = vld [vmem:[#allocation7 + $0x50] sm:$0xff]  ;;  %v524_v63 = vld [vmem:[#allocation7 + $0x48] sm:$0xff] }
  0x6b   : > { %846 = vmatprep.subr.mxu1 %v341_v30  ;;  %774 = vmatprep.subr.mxu0 %v324_v31  ;;  %v527_v60 = vld [vmem:[#allocation7 + $0x60] sm:$0xff]  ;;  %v522_v1 = vld [vmem:[#allocation7 + $0x38] sm:$0xff]  ;;  %v521_v2 = vld [vmem:[#allocation7 + $0x30] sm:$0xff] }
  0x6c   : > { %847 = vmatpush3.msra.mxu1 %v341_v30  ;;  %775 = vmatpush3.msra.mxu0 %v308_v32  ;;  %v523_v0 = vld [vmem:[#allocation7 + $0x40] sm:$0xff]  ;;  %v520_v3 = vld [vmem:[#allocation7 + $0x28] sm:$0xff]  ;;  %v518_v5 = vld [vmem:[#allocation7 + $0x18] sm:$0xff] }
  0x6d   : > { %848 = vmatprep.subr.mxu1 %v340_v33  ;;  %776 = vmatprep.subr.mxu0 %v323_v34  ;;  %v519_v4 = vld [vmem:[#allocation7 + $0x20] sm:$0xff]  ;;  %v517_v6 = vld [vmem:[#allocation7 + $0x10] sm:$0xff]  ;;  %v516_v7 = vld [vmem:[#allocation7 + $0x8] sm:$0xff] }
  0x6e   : > { %849 = vmatpush3.msra.mxu1 %v340_v33  ;;  %777 = vmatpush3.msra.mxu0 %v307_v35  ;;  %v515_v8 = vld [vmem:[#allocation7] sm:$0xff] }
  0x6f   : > { %850 = vmatprep.subr.mxu1 %v339_v36  ;;  %778 = vmatprep.subr.mxu0 %v322_v37  ;;  %v747_v23 = vld [vmem:[%s1380_s3] ss:$0 sm:$0xff] }
  0x70   : > { %851 = vmatpush3.msra.mxu1 %v339_v36  ;;  %779 = vmatpush3.msra.mxu0 %v306_v38 }
  0x71   : > { %852 = vmatprep.subr.mxu1 %v338_v39  ;;  %780 = vmatprep.subr.mxu0 %v321_v40 }
  0x72   : > { %853 = vmatpush3.msra.mxu1 %v338_v39  ;;  %781 = vmatpush3.msra.mxu0 %v305_v41 }
  0x73   : > { %854 = vmatprep.subr.mxu1 %v337_v42  ;;  %782 = vmatprep.subr.mxu0 %v320_v43 }
  0x74   : > { %855 = vmatpush3.msra.mxu1 %v337_v42  ;;  %783 = vmatpush3.msra.mxu0 %v304_v44 }
  0x75   : > { %856 = vmatprep.subr.mxu1 %v336_v45  ;;  %784 = vmatprep.subr.mxu0 %v319_v46 }
  0x76   : > { %415 = vmatprep.mubr.f32.mxu0 %v298_v47  ;;  %785 = vmatpush3.msra.mxu0 %v303_v48 }
  0x77   : > { %857 = vmatpush3.msra.mxu1 %v336_v45  ;;  %416 = vmatmul.mubr.f32.vlgmr.msra.gmra.mxu0 %v297_v49 }
  0x78   : > { %858 = vmatprep.subr.mxu1 %v335_v50  ;;  %860 = vmatprep.mubr.f32.mxu1 %v299_v51 }
  0x79   : > { %859 = vmatpush3.msra.mxu1 %v335_v50  ;;  %420 = vmatprep.mubr.f32.mxu0 %v301_v53 }
  0x7a   : > { %861 = vmatmul.mubr.f32.vlgmr.msra.gmra.mxu1 %v302_v52  ;;  %505 = vperm.xlu0 %975, %v501_v54  }
  0x7b   : > { %863 = vmatprep.subr.mxu0 %v530_v55  ;;  %421 = vmatmul.mubr.f32.gmra.mxu0 %v300_v56 }
  0x7c   : > { %864 = vmatpush3.msra.mxu0 %v530_v55 }
  0x7d   : > { %865 = vmatprep.subr.mxu0 %v529_v57 }
  0x7e   : > { %510 = vperm.xlu0 %975, %v502_v58   ;;  %866 = vmatpush3.msra.mxu0 %v529_v57 }
  0x7f   : > { %867 = vmatprep.subr.mxu0 %v528_v59 }
  0x80   : > { %868 = vmatpush3.msra.mxu0 %v528_v59 }
  0x81   : > { %869 = vmatprep.subr.mxu0 %v527_v60 }
  0x82   : > { %870 = vmatpush3.msra.mxu0 %v527_v60 }
  0x83   : > { %871 = vmatprep.subr.mxu0 %v526_v61 }
  0x84   : > { %872 = vmatpush3.msra.mxu0 %v526_v61 }
  0x85   : > { %873 = vmatprep.subr.mxu0 %v525_v62 }
  0x86   : > { %874 = vmatpush3.msra.mxu0 %v525_v62 }
  0x87   : > { %875 = vmatprep.subr.mxu0 %v524_v63 }
  0x88   : > { %876 = vmatpush3.msra.mxu0 %v524_v63 }
  0x89   : > { %877 = vmatprep.subr.mxu0 %v523_v0 }
  0x8a   : > { %878 = vmatpush3.msra.mxu0 %v523_v0 }
  0x8b   : > { %879 = vmatprep.subr.mxu0 %v522_v1 }
  0x8c   : > { %880 = vmatpush3.msra.mxu0 %v522_v1 }
  0x8d   : > { %881 = vmatprep.subr.mxu0 %v521_v2 }
  0x8e   : > { %882 = vmatpush3.msra.mxu0 %v521_v2 }
  0x8f   : > { %883 = vmatprep.subr.mxu0 %v520_v3 }
  0x90   : > { %884 = vmatpush3.msra.mxu0 %v520_v3 }
  0x91   : > { %885 = vmatprep.subr.mxu0 %v519_v4 }
  0x92   : > { %886 = vmatpush3.msra.mxu0 %v519_v4 }
  0x93   : > { %887 = vmatprep.subr.mxu0 %v518_v5 }
  0x94   : > { %888 = vmatpush3.msra.mxu0 %v518_v5 }
  0x95   : > { %889 = vmatprep.subr.mxu0 %v517_v6 }
  0x96   : > { %890 = vmatpush3.msra.mxu0 %v517_v6 }
  0x97   : > { %891 = vmatprep.subr.mxu0 %v516_v7 }
  0x98   : > { %892 = vmatpush3.msra.mxu0 %v516_v7 }
  0x99   : > { %893 = vmatprep.subr.mxu0 %v515_v8 }
  0x9a   : > { %894 = vmatpush3.msra.mxu0 %v515_v8 }
  0xf5   : > { %v506_v12 = vpop.permute.xlu0 %505 }
  0xf9   : > { %v511_v21 = vpop.permute.xlu0 %510 }
 0x137   : > { %v786_v9 = vpop.f32.mrf.mxu0 }
 0x139   : > { %v787_v10 = vpop.f32.mrf.mxu0 }
 0x13a   : > { %v862_v11 = vpop.f32.mrf.mxu1  ;;  %v788_v13 = vadd.f32 %v787_v10, %v786_v9 }
 0x13b   : > { %v789_v14 = vpop.f32.mrf.mxu0 }
 0x13c   : > { %v492_v15 = vpop.f32.mrf.mxu1 }
 0x13d   : > { %v493_v16 = vadd.f32 %v788_v13, %v492_v15  ;;  %v790_v17 = vpop.f32.mrf.mxu0 }
 0x13e   : > { %v791_v19 = vadd.f32 %v790_v17, %v789_v14 }
 0x13f   : > { %v513_v18 = vmul.f32 %v506_v12, %v493_v16 }
 0x140   : > { %v498_v20 = vadd.f32 %v862_v11, %v791_v19 }
 0x141   : > { %895 = vmatprep.mubr.f32.mxu0 %v513_v18 }
 0x142   : > { %v514_v22 = vmul.f32 %v511_v21, %v498_v20 }
 0x144   : > { %896 = vmatmul.mubr.f32.vlgmr.msra.gmra.mxu0 %v514_v22 }
 0x204   : > { %v897_v24 = vpop.f32.mrf.mxu0 }
 0x205   : > { %v610_v25 = vadd.f32 %v897_v24, %v747_v23 }
 0x206   : > { %v604_v26 = vpop.f32.mrf.mxu0 }
 0x207   : > { %614 = vst [vmem:[%s288_s10 + $0x8] sm:$0xff] %v610_v25  ;;  %v605_v27 = vadd.f32 %v747_v23, %v604_v26 }
 0x209   : > { %613 = vst [vmem:[%s288_s10] sm:$0xff] %v605_v27 }
 0x20a   : > { %1069 = shalt.err (!%p1066_p13)
}
 0x20b   : > { %s1070_s11 = scalar_lea.hbm %s1334_s7, 256  ;;  %s1074_s29 = scalar_lea.hbm %s1382_s5, 512 }
 0x20c   : > { %p1071_p5 = scmp.ne.s32.totalorder %s1334_s7, %s1070_s11  ;;  %p1075_p8 = scmp.lt.s32.totalorder %s1334_s7, %s1382_s5 }
 0x20d   : > { %p1076_p3 = scmp.lt.s32.totalorder %s1074_s29, %s1070_s11 }
 0x20e   : > { %p1072_p0 = pnand %p1071_p5, %p1399_p1 }
 0x20f   : > { %p1077_p11 = por %p1076_p3, %p1075_p8 }
 0x210   : > { %p1073_p4 = pneg %p1072_p0 }
 0x212   : > { %p1078_p10 = pnand %p1077_p11, %p1073_p4 }
 0x214   : > { %1081 = shalt.err (!%p1078_p10)
}
 0x215   : > { %s1135_s14 = smov 128   ;;  %s1136_s17 = smov 8  }
 0x216   : > { %911 = dma.vmem_to_hbm [thread:$0]  (%p1399_p1), %s1329_s13, 256, %s1334_s7, %s616_s24, %s1135_s14, %s1135_s14, %s1136_s17  }
 0x217 PF: > { %s644_s30 = sand.u32 1, %s1112_s18   ;;  %p1400_p2 = scmp.ne.s32.totalorder %s1388_s25, 0 }
 0x218   : > { %p1401_p6 = scmp.ge.s32.totalorder %s1124_s21, 2  ;;  %s645_s26 = scalar_lea.sflag [#allocation4], %s644_s30 }
 0x21a   : > { %p925_p12 = pnand %p1401_p6, %p1400_p2 }
 0x21c   : > { %p926_p7 = pneg %p925_p12 }
 0x21e   : > { %1107 = dma.done.wait (%p926_p7), %s645_s26, 256  }
 0x21f   : > { %1109 = vsyncadd (%p926_p7), %s645_s26, 4294967040  ;;  %p19_p9 = scmp.ge.s32.totalorder %s1239_s15, 4   ;;  %s1402_s18 = smov %s1116_s19 }
 0x220   : > { %s1403_s19 = smov %s1120_s20  ;;  %s1404_s20 = smov %s1255_s27 }
 0x221   : > { %s1405_s21 = smov %s1239_s15  ;;  %21 = sbr.rel (!%p19_p9) target bundleno = 6 (0x6), region = 96 }
 0x226   :  { %650 = vsyncpa [#allocation3], 1 }
 0x227   :  { %652 = vsyncpa [#allocation3 + $0x1], 1 }
 0x228   :  { %653 = vsyncpa [#allocation6], 1 }
 0x229   :  { %654 = vsyncpa [#allocation4], 1 }
 0x22a   :  { %656 = vsyncpa [#allocation4 + $0x1], 1 }

</bundles_post_ra>
